<compile_context>
chip_gen: v7x
topology: tpu7x:2x2x1
jax: 0.10.0
libtpu: 0.0.40
codegen_flags: <defaults>
</compile_context>

<pallas_src>
import jax
import jax.numpy as jnp
from jax.experimental import pallas as pl
from jax.experimental.pallas import tpu as pltpu


_LEAKY_SLOPE = 0.01  # nn.LeakyReLU() default negative_slope


# ---------------------------------------------------------------------------
# Fused single-pass kernel: pool + excitation + scale on a (TB, C, HW) block.
# ---------------------------------------------------------------------------
def _ca_fused_kernel(x_ref, w1t_ref, w2t_ref, o_ref):
    # Pool: f32 sum over the lane (HW) axis; 1/HW is pre-folded into w1t.
    pooled = jnp.sum(x_ref[...].astype(jnp.float32), axis=-1)              # (TB, C)
    # Excitation: 1x1 conv (C -> C/r) + LeakyReLU + 1x1 conv (C/r -> C) + sigmoid.
    h = jnp.dot(pooled, w1t_ref[...], preferred_element_type=jnp.float32)  # (TB, C_r)
    h = jnp.where(h > 0, h, jnp.float32(_LEAKY_SLOPE) * h)
    gate = jax.nn.sigmoid(
        jnp.dot(h, w2t_ref[...], preferred_element_type=jnp.float32))      # (TB, C) f32
    # Scale: re-read the block from VMEM (keeps the big live range short,
    # vld slots are plentiful), multiply in f32, cast the product once.
    o_ref[...] = (x_ref[...].astype(jnp.float32) * gate[:, :, None]).astype(o_ref.dtype)


# ---------------------------------------------------------------------------
# Two-pass (spatially tiled) path for images that do not fit VMEM.
# ---------------------------------------------------------------------------
def _make_pool_excite_kernel(hw_total, thw):
    rem = hw_total % thw  # static: mask only when HW tiles do not divide evenly

    def kernel(x_ref, w1t_ref, w2t_ref, gate_ref, acc_ref):
        s = pl.program_id(1)  # HW-tile index (reduction axis, innermost)

        @pl.when(s == 0)
        def _():
            acc_ref[...] = jnp.zeros_like(acc_ref)

        xb = x_ref[...].astype(jnp.float32)                                # (1, C, THW)
        if rem != 0:
            col = jax.lax.broadcasted_iota(jnp.int32, xb.shape, dimension=2)
            xb = jnp.where(s * thw + col < hw_total, xb, 0.0)
        acc_ref[...] += jnp.sum(xb, axis=-1)                               # (1, C)

        @pl.when(s == pl.num_programs(1) - 1)
        def _():
            # 1/HW is pre-folded into w1t, so acc (= sum) feeds the MLP directly.
            h = jnp.dot(acc_ref[...], w1t_ref[...], preferred_element_type=jnp.float32)
            h = jnp.where(h > 0, h, jnp.float32(_LEAKY_SLOPE) * h)
            g = jax.nn.sigmoid(jnp.dot(h, w2t_ref[...], preferred_element_type=jnp.float32))
            gate_ref[...] = g[:, :, None]                                  # (1, C, 1)

    return kernel


def _ca_scale_kernel(x_ref, gate_ref, o_ref):
    # gate_ref: (1, C, 1) f32; broadcast over the HW tile, cast the product once.
    o_ref[...] = (x_ref[...].astype(jnp.float32) * gate_ref[...]).astype(o_ref.dtype)


# ---------------------------------------------------------------------------
# Host-side helpers.
# ---------------------------------------------------------------------------
def _vmem_ceiling_bytes():
    """Per-generation cap on the scoped-VMEM request.

    v7x: 64 MiB physical per TensorCore -> ~56 MiB; v5e/v6e: 128 MiB -> ~100 MiB.
    """
    phys = 0
    try:
        phys = int(getattr(pltpu.get_tpu_info(), "vmem_capacity_bytes", 0))
    except Exception:
        phys = 0
    if phys < (32 << 20):
        phys = 64 << 20  # conservative fallback = v7x per-core VMEM
    return min(phys - (8 << 20), 100 << 20)


def _pick_tb(B, per_image_bytes, max_block_bytes,
             min_block_bytes=1 << 20, min_steps=8):
    """Batch tile for the fused path, or None if a single image does not fit."""
    if per_image_bytes > max_block_bytes:
        return None
    divisors = [d for d in range(1, B + 1) if B % d == 0]
    fitting = [d for d in divisors if d * per_image_bytes <= max_block_bytes]
    # Prefer >= min_steps grid steps (hides pipeline prologue/epilogue) while
    # keeping each block >= ~1 MiB (already ~85% of HBM roofline).
    deep = [d for d in fitting if B // d >= min_steps]
    if deep:
        big = [d for d in deep if d * per_image_bytes >= min_block_bytes]
        return max(big) if big else max(deep)
    # B < min_steps: maximize the step count subject to the block-size floor.
    big = [d for d in fitting if d * per_image_bytes >= min_block_bytes]
    if big:
        return min(big)
    # Everything is tiny: >=2 steps at least keeps both v7x TensorCores busy.
    two = [d for d in fitting if B // d >= 2]
    return max(two) if two else max(fitting)


def channel_attention(x, w1, w2, *, max_block_bytes=None):
    """SE-style channel attention.

    x:  (B, C, H, W)
    w1: (C_r, C, 1, 1)  first 1x1 conv weight (bias-free)
    w2: (C, C_r, 1, 1)  second 1x1 conv weight (bias-free)
    """
    B, C, H, W = x.shape
    HW = H * W
    C_r = w1.shape[0]
    itemsize = jnp.dtype(x.dtype).itemsize

    ceiling = _vmem_ceiling_bytes()
    if max_block_bytes is None:
        # double-buffered in + out blocks (4x) + headroom must stay under the cap
        max_block_bytes = (ceiling - (4 << 20)) // 4

    # 1x1 conv weights in matmul form; the 1/HW of the mean is folded into w1t.
    w1t = (jnp.transpose(w1[:, :, 0, 0], (1, 0)).astype(jnp.float32)
           / jnp.float32(HW))                                    # (C, C_r)
    w2t = jnp.transpose(w2[:, :, 0, 0], (1, 0)).astype(jnp.float32)  # (C_r, C)
    weight_bytes = 2 * 4 * (int(w1t.size) + int(w2t.size))

    # Lane-dense layout: flatten spatial dims so the last (lane) axis is H*W.
    x3 = x.reshape(B, C, HW)
    per_image_bytes = C * HW * itemsize

    TB = _pick_tb(B, per_image_bytes, max_block_bytes)

    if TB is not None:
        # ---------------- fused single-pass path ----------------
        block_bytes = TB * per_image_bytes
        vmem_limit = int(min(4 * block_bytes + weight_bytes + (4 << 20), ceiling))
        out3 = pl.pallas_call(
            _ca_fused_kernel,
            out_shape=jax.ShapeDtypeStruct((B, C, HW), x.dtype),
            grid_spec=pltpu.PrefetchScalarGridSpec(
                num_scalar_prefetch=0,
                grid=(B // TB,),
                in_specs=[
                    pl.BlockSpec((TB, C, HW), lambda b: (b, 0, 0)),
                    pl.BlockSpec((C, C_r), lambda b: (0, 0)),
                    pl.BlockSpec((C_r, C), lambda b: (0, 0)),
                ],
                out_specs=pl.BlockSpec((TB, C, HW), lambda b: (b, 0, 0)),
            ),
            input_output_aliases={0: 0},
            compiler_params=pltpu.CompilerParams(
                dimension_semantics=("parallel",),
                vmem_limit_bytes=vmem_limit,
            ),
        )(x3, w1t, w2t)
        return out3.reshape(B, C, H, W)

    # ---------------- spatially-tiled two-pass path ----------------
    # One image block does not fit (e.g. large C*H*W on v7x's 64 MiB VMEM):
    # tile H*W in 128-lane multiples; pass 1 reduces pooled sums + computes the
    # gates, pass 2 streams the same tiles again and applies the gates.
    cols_budget = max(1, max_block_bytes // (C * itemsize))
    THW = min(HW, max(128, (cols_budget // 128) * 128))
    n_hw = pl.cdiv(HW, THW)
    tile_bytes = C * THW * itemsize
    gate_bytes = 4 * B * C * 4

    pool_vmem = int(min(2 * tile_bytes + weight_bytes + gate_bytes + (4 << 20), ceiling))
    gates = pl.pallas_call(
        _make_pool_excite_kernel(HW, THW),
        out_shape=jax.ShapeDtypeStruct((B, C, 1), jnp.float32),
        grid_spec=pltpu.PrefetchScalarGridSpec(
            num_scalar_prefetch=0,
            grid=(B, n_hw),
            in_specs=[
                pl.BlockSpec((1, C, THW), lambda b, s: (b, 0, s)),
                pl.BlockSpec((C, C_r), lambda b, s: (0, 0)),
                pl.BlockSpec((C_r, C), lambda b, s: (0, 0)),
            ],
            out_specs=pl.BlockSpec((1, C, 1), lambda b, s: (b, 0, 0)),
            scratch_shapes=[pltpu.VMEM((1, C), jnp.float32)],
        ),
        compiler_params=pltpu.CompilerParams(
            dimension_semantics=("parallel", "arbitrary"),
            vmem_limit_bytes=pool_vmem,
        ),
    )(x3, w1t, w2t)

    scale_vmem = int(min(4 * tile_bytes + gate_bytes + (4 << 20), ceiling))
    out3 = pl.pallas_call(
        _ca_scale_kernel,
        out_shape=jax.ShapeDtypeStruct((B, C, HW), x.dtype),
        grid_spec=pltpu.PrefetchScalarGridSpec(
            num_scalar_prefetch=0,
            grid=(B, n_hw),
            in_specs=[
                pl.BlockSpec((1, C, THW), lambda b, s: (b, 0, s)),
                pl.BlockSpec((1, C, 1), lambda b, s: (b, 0, 0)),
            ],
            out_specs=pl.BlockSpec((1, C, THW), lambda b, s: (b, 0, s)),
        ),
        input_output_aliases={0: 0},
        compiler_params=pltpu.CompilerParams(
            dimension_semantics=("parallel", "parallel"),
            vmem_limit_bytes=scale_vmem,
        ),
    )(x3, gates)

    return out3.reshape(B, C, H, W)


if __name__ == "__main__":
    B, C, H, W = 2, 8, 16, 16
    ratio = 4
    C_r = C // ratio

    key = jax.random.PRNGKey(0)
    kx, k1, k2, kx2 = jax.random.split(key, 4)

    x = jax.random.normal(kx, (B, C, H, W), dtype=jnp.float32)
    # deterministic synthetic conv weights (nn.Conv2d(..., 1, 1, 0, bias=False) shapes)
    w1 = 0.1 * jax.random.normal(k1, (C_r, C, 1, 1), dtype=jnp.float32)
    w2 = 0.1 * jax.random.normal(k2, (C, C_r, 1, 1), dtype=jnp.float32)

    def reference(xv):
        pooled = jnp.mean(xv, axis=(2, 3))                       # (B, C)
        h = pooled @ w1[:, :, 0, 0].T
        h = jnp.where(h > 0, h, 0.01 * h)
        g = jax.nn.sigmoid(h @ w2[:, :, 0, 0].T)                 # (B, C)
        return xv * g[:, :, None, None]

    run = jax.jit(channel_attention, static_argnames=("max_block_bytes",))

    # 1) fused single-pass path
    out = run(x, w1, w2)
    jax.block_until_ready(out)
    assert jnp.allclose(out, reference(x), atol=1e-5, rtol=1e-5)

    # 2) spatially-tiled two-pass path (forced with a tiny block budget; the
    #    10x16 spatial size also exercises the HW-remainder mask: 160 = 128 + 32)
    x2 = jax.random.normal(kx2, (1, C, 10, 16), dtype=jnp.float32)
    out2 = run(x2, w1, w2, max_block_bytes=4096)
    jax.block_until_ready(out2)
    assert jnp.allclose(out2, reference(x2), atol=1e-5, rtol=1e-5)

    print("KERNEL_OK")
</pallas_src>

<mosaic_0001>
module attributes {stable_mosaic.version = 11 : i64} {
  func.func @_ca_fused_kernel(%arg0: i32, %arg1: memref<1x8x256xf32, #tpu.memory_space<vmem>>, %arg2: memref<8x2xf32, #tpu.memory_space<vmem>>, %arg3: memref<2x8xf32, #tpu.memory_space<vmem>>, %arg4: memref<1x8x256xf32, #tpu.memory_space<vmem>>) attributes {dimension_semantics = [#tpu.dimension_semantics<parallel>], iteration_bounds = array<i64: 2>, scalar_prefetch = 0 : i64, scratch_operands = 0 : i64, tpu.core_type = #tpu.core_type<tc>, window_params = [{transform_indices = @transform_0, window_bounds = array<i64: 1, 8, 256>}, {pipeline_mode = #tpu.pipeline_mode<synchronous>, transform_indices = @transform_1, window_bounds = array<i64: 8, 2>}, {pipeline_mode = #tpu.pipeline_mode<synchronous>, transform_indices = @transform_2, window_bounds = array<i64: 2, 8>}, {transform_indices = @transform_3, window_bounds = array<i64: 1, 8, 256>}]} {
    %c0 = arith.constant 0 : index
    %c0_0 = arith.constant 0 : index
    %c0_1 = arith.constant 0 : index
    %0 = vector.load %arg1[%c0, %c0_0, %c0_1] : memref<1x8x256xf32, #tpu.memory_space<vmem>>, vector<1x8x256xf32>
    %cst = arith.constant dense<0.000000e+00> : vector<1x8xf32>
    %1 = vector.multi_reduction <add>, %0, %cst [2] : vector<1x8x256xf32> to vector<1x8xf32>
    %c0_2 = arith.constant 0 : index
    %c0_3 = arith.constant 0 : index
    %2 = vector.load %arg2[%c0_2, %c0_3] : memref<8x2xf32, #tpu.memory_space<vmem>>, vector<8x2xf32>
    %cst_4 = arith.constant dense<0.000000e+00> : vector<1x2xf32>
    %3 = tpu.matmul %1, %2, %cst_4 {dimension_numbers = #tpu.dot_dimension_numbers<[1], [0], [0], [1], [0, 0, 1, 1], [], []>} : vector<1x8xf32>, vector<8x2xf32>, vector<1x2xf32> -> vector<1x2xf32>
    %cst_5 = arith.constant 0.000000e+00 : f32
    %4 = vector.broadcast %cst_5 : f32 to vector<1x2xf32>
    %5 = arith.cmpf ogt, %3, %4 : vector<1x2xf32>
    %cst_6 = arith.constant 0.00999999977 : f32
    %6 = vector.broadcast %cst_6 : f32 to vector<1x2xf32>
    %7 = arith.mulf %6, %3 : vector<1x2xf32>
    %8 = arith.select %5, %3, %7 : vector<1x2xi1>, vector<1x2xf32>
    %c0_7 = arith.constant 0 : index
    %c0_8 = arith.constant 0 : index
    %9 = vector.load %arg3[%c0_7, %c0_8] : memref<2x8xf32, #tpu.memory_space<vmem>>, vector<2x8xf32>
    %cst_9 = arith.constant dense<0.000000e+00> : vector<1x8xf32>
    %10 = tpu.matmul %8, %9, %cst_9 {dimension_numbers = #tpu.dot_dimension_numbers<[1], [0], [0], [1], [0, 0, 1, 1], [], []>} : vector<1x2xf32>, vector<2x8xf32>, vector<1x8xf32> -> vector<1x8xf32>
    %11 = arith.negf %10 : vector<1x8xf32>
    %12 = math.exp %11 : vector<1x8xf32>
    %cst_10 = arith.constant 1.000000e+00 : f32
    %13 = vector.broadcast %cst_10 : f32 to vector<1x8xf32>
    %14 = arith.addf %13, %12 : vector<1x8xf32>
    %15 = arith.divf %13, %14 : vector<1x8xf32>
    %c0_11 = arith.constant 0 : index
    %c0_12 = arith.constant 0 : index
    %c0_13 = arith.constant 0 : index
    %16 = vector.load %arg1[%c0_11, %c0_12, %c0_13] : memref<1x8x256xf32, #tpu.memory_space<vmem>>, vector<1x8x256xf32>
    %17 = vector.shape_cast %15 : vector<1x8xf32> to vector<1x8x1xf32>
    %18 = vector.broadcast %17 : vector<1x8x1xf32> to vector<1x8x256xf32>
    %19 = arith.mulf %16, %18 : vector<1x8x256xf32>
    %c0_14 = arith.constant 0 : index
    %c0_15 = arith.constant 0 : index
    %c0_16 = arith.constant 0 : index
    %20 = vector.load %arg4[%c0_14, %c0_15, %c0_16] : memref<1x8x256xf32, #tpu.memory_space<vmem>>, vector<1x8x256xf32>
    tpu.vector_store %arg4[%c0_14, %c0_15, %c0_16], %19 {strides = array<i32>} : memref<1x8x256xf32, #tpu.memory_space<vmem>>, vector<1x8x256xf32>,
    return
  }
  func.func @transform_0(%arg0: i32) -> (i32, i32, i32) {
    %c0_i32 = arith.constant 0 : i32
    %c0_i32_0 = arith.constant 0 : i32
    %c0_i32_1 = arith.constant 0 : i32
    return %arg0, %c0_i32, %c0_i32_0 : i32, i32, i32
  }
  func.func @transform_1(%arg0: i32) -> (i32, i32) {
    %c0_i32 = arith.constant 0 : i32
    %c0_i32_0 = arith.constant 0 : i32
    %c0_i32_1 = arith.constant 0 : i32
    return %c0_i32, %c0_i32_0 : i32, i32
  }
  func.func @transform_2(%arg0: i32) -> (i32, i32) {
    %c0_i32 = arith.constant 0 : i32
    %c0_i32_0 = arith.constant 0 : i32
    %c0_i32_1 = arith.constant 0 : i32
    return %c0_i32, %c0_i32_0 : i32, i32
  }
  func.func @transform_3(%arg0: i32) -> (i32, i32, i32) {
    %c0_i32 = arith.constant 0 : i32
    %c0_i32_0 = arith.constant 0 : i32
    %c0_i32_1 = arith.constant 0 : i32
    return %arg0, %c0_i32, %c0_i32_0 : i32, i32, i32
  }
}

</mosaic_0001>

<bundles_post_ra>
// kernel: channel_attention.1
= control target key start
LH: loop header
LB: loop body
LE: loop exit
PB: predicated region body
PF: predicated region fallthrough
CT: control target
= control target key end

     0   :  { %s486_s12 = smov 0   ;;  %s516_s0 = inlined_call_operand.vmem [shape: f32[2,8,256], index: 0, kind: input, shape index: {}, may-alias: {0,3}]   ;;  %s517_s1 = inlined_call_operand.vmem [shape: f32[8,2], index: 1, kind: input, shape index: {}]   ;;  %s518_s2 = inlined_call_operand.vmem [shape: f32[2,8], index: 2, kind: input, shape index: {}]   ;;  %s519_s3 = inlined_call_operand.vmem [shape: f32[2,8,256], index: 3, kind: output, shape index: {}, may-alias: {0,3}]  }
   0x1 LB: > { %s411_s13 = sadd.s32 4294967295, %s462_s12   ;;  %p415_p0 = scmp.ge.s32.totalorder %s462_s12, 1  ;;  %s462_s12 = sphi %s486_s12, %s13_s12  }
   0x2   : > { %p137_p1 = scmp.lt.s32.totalorder %s462_s12, 3 }
   0x4   : > { %p138_p2 = pnand %p415_p0, %p137_p1 }
   0x5   : > { %p161_p3 = scmp.lt.s32.totalorder (!%p138_p2), %s411_s13, 1  ;;  %v464_v3 = vmov (!%p138_p2), 0.0   ;;  %v176_v4 = vld [vmem:[%s517_s1] sm:$0xff] (!%p138_p2)  ;;  %vm465_vm0 = vmmov (!%p138_p2), 0   ;;  %v178_v5 = vlaneseq (!%p138_p2)  ;;  %vm184_vm1 = vcmask (!%p138_p2), 64512  }
   0x6   : > { %141 = sbr.rel (%p138_p2) target bundleno = 736 (0x2e0), region = 32  ;;  %432 = vmatprep.subr.mxu0 (!%p138_p2), %v464_v3  ;;  %437 = vmatprep.subr.mxu1 (!%p138_p2), %v464_v3  ;;  %v260_v11 = vld [vmem:[%s518_s2] sm:$0x3] (!%p138_p2)  ;;  %vm265_vm2 = vcmask (!%p138_p2), 1041408   ;;  %vm261_vm4 = vcmask (!%p138_p2), 15360  }
   0x7   : > { %433 = vmatpush3.msra.mxu0 (!%p138_p2), %v176_v4  ;;  %434 = vmatprep.mubr.msk.f32.mxu0 (!%p138_p2), %vm465_vm0, %v464_v3  ;;  %v179_v6 = vand.u32 (!%p138_p2), 127, %v178_v5  ;;  %v181_v7 = vshrl.u32 (!%p138_p2), %v178_v5, 7 }
   0x8   : > { %439 = vmatprep.mubr.msk.f32.mxu1 (!%p138_p2), %vm465_vm0, %v464_v3  ;;  %438 = vmatpush3.msk.msra.mxu1 (!%p138_p2), %vm265_vm2, %v260_v11 }
   0x9   : > { %v182_v8 = vsub.s32 (!%p138_p2), %v179_v6, %v181_v7  ;;  %v347_v21 = vsub.s32 (!%p138_p2), 0, %v181_v7 }
   0xd   : > { %s521_s13 = smov (!%p161_p3, %s411_s13), 1 }
   0xe   : > { %s426_s14 = sshll.u32 %s521_s13, 4 }
   0xf   : > { %s165_s17 = scalar_lea.vmem %s516_s0, %s426_s14  ;;  %s170_s24 = scalar_lea.vmem %s519_s3, %s426_s14 }
  0x10   : > { %v171_v0 = vld [vmem:[%s165_s17] sm:$0xff]  ;;  %v172_v1 = vld [vmem:[%s165_s17 + $0x8] sm:$0xff] }
  0x11   : > { %v173_v2 = vadd.f32 %v172_v1, %v171_v0 }
  0x13   : > { %174 = vadd.xlane.f32.xlu0 %v173_v2 }
  0xa0   : > { %v175_v9 = vpop.xlane.xlu0 %174 }
  0xa1   : > { %v183_v10 = vrot.slane %v175_v9, %v182_v8 }
  0xa3   : > { %435 = vmatmul.mubr.msk.f32.vlgmr.msra.gmra.mrb[0].mxu0 %vm184_vm1, %v183_v10 }
 0x176   : > { %v253_v12 = vpop.f32.mrb[0].mxu0 }
 0x177   : > { %vm257_vm3 = vcmp.gt.f32.partialorder %v253_v12, 0.0  ;;  %v258_v13 = vmul.f32 0.01, %v253_v12  ;;  %v436_v14 = vpop.f32.mrb[1].mxu0 }
 0x179   : > { %v259_v15 = vsel %vm257_vm3, %v253_v12, %v258_v13 }
 0x17a   : > { %440 = vmatmul.mubr.msk.f32.vlgmr.msra.gmra.mrb[0].mxu1 %vm261_vm4, %v259_v15 }
 0x24d   : > { %v335_v16 = vpop.f32.mrb[0].mxu1 }
 0x24e   : > { %v423_v17 = vmul.f32 -1.442695, %v335_v16  ;;  %v441_v18 = vpop.f32.mrb[1].mxu1 }
 0x250   : > { %452 = vpow2.f32 %v423_v17 }
 0x25a   : > { %v453_v19 = vpop.eup %452 }
 0x25b   : > { %v342_v20 = vadd.f32 1.0, %v453_v19 }
 0x25d   : > { %454 = vrcp.f32 %v342_v20 }
 0x267   : > { %v455_v22 = vpop.eup %454 }
 0x268   : > { %v348_v23 = vrot.slane %v455_v22, %v347_v21 }
 0x26a   : > { %350 = vbcast.lane.b32.xlu0 %v348_v23, 256 }
 0x2dc   : > { %v351_v24 = vpop.permute.xlu0 %350 }
 0x2dd   : > { %v352_v25 = vmul.f32 %v351_v24, %v171_v0  ;;  %v353_v26 = vmul.f32 %v351_v24, %v172_v1 }
 0x2df   : > { %354 = vst [vmem:[%s170_s24] sm:$0xff] %v352_v25  ;;  %355 = vst [vmem:[%s170_s24 + $0x8] sm:$0xff] %v353_v26 }
 0x2e0 PF: > { %s13_s12 = sadd.s32 1, %s462_s12  }
 0x2e1   : > { %p10_p4 = scmp.ge.s32.totalorder %s13_s12, 4  }
 0x2e3   :  { %12 = sbr.rel (!%p10_p4) target bundleno = 1 (0x1), region = 62 }

</bundles_post_ra>
